<compile_context>
chip_gen: v6e
topology: v6e:2x2x1
jax: 0.10.0
libtpu: 0.0.40
codegen_flags: <defaults>
</compile_context>

<pallas_src>
import functools

import jax
import jax.numpy as jnp
from jax.experimental import pallas as pl
from jax.experimental.pallas import tpu as pltpu

EPS = 1e-5


def lstm_kernel(data_ref, w_ref, p_ref, o_ref, *, T, I, H):
    """data: (T+2, I+H)  rows 0..T-1=[x|0], row T=[0|h0], row T+1=[c0|0]
       w:    (I+2H, GW)  rows [0,I)=wx, [I,I+H)=wh, [I+H,I+2H)=wd (lane-padded)
       p:    (8, GW)     rows: bh4, a2x4, a2h4, (b2x4+b2h4), a2c, b2c, bd, 0
       o:    (T+1, GW)   rows 0..T-1 = [hx|cx|0], row T = [decoder out|0]"""
    G = 4 * H
    GW = o_ref.shape[1]

    data = data_ref[...]                                    # (T+2, I+H)

    # --- single fused MXU call: gx in rows 0..T-1, gh in row T (row T+1 ignored) ----------
    g_all = jnp.dot(data, w_ref[0:I + H, :],
                    preferred_element_type=jnp.float32)     # (T+2, GW)
    gx = g_all[0:T, :]                                      # x @ wx  (bx dropped: cancels in time-LN)
    gh = g_all[T:T + 1, :] + p_ref[0:1, :]                  # h0 @ wh + bh

    # --- lnx: time-LayerNorm fused over the whole (T, 4H) gate block -----------------------
    mu_t = jnp.mean(gx, axis=0, keepdims=True)
    d_t = gx - mu_t                                         # hoisted, reused below
    var_t = jnp.sum(d_t * d_t, axis=0, keepdims=True) * (1.0 / (T - 1))
    inv_t = pl.reciprocal(jnp.sqrt(var_t) + EPS, approx=False)
    gx_n = d_t * (inv_t * p_ref[1:2, :])                    # scale folded; shift deferred to bsum

    # --- lnh: hidden-LayerNorm per gate on gh (stats over each gate's H lanes) -------------
    def ln_h_gate(g):
        z = gh[:, g * H:(g + 1) * H]                        # (1, H)
        mu = jnp.mean(z, axis=1, keepdims=True)
        dv = z - mu
        var = jnp.sum(dv * dv, axis=1, keepdims=True) * (1.0 / (H - 1))
        inv = pl.reciprocal(jnp.sqrt(var) + EPS, approx=False)
        return dv * inv

    parts = [ln_h_gate(g) for g in range(4)]
    if GW > G:
        parts.append(jnp.zeros((1, GW - G), jnp.float32))
    gh_n = jnp.concatenate(parts, axis=1) * p_ref[2:3, :]   # (1, GW), one fused scale

    gates = gx_n + gh_n + p_ref[3:4, :]                     # (T, GW); pre-summed b2x+b2h shift

    # --- nonlinearities: one EUP tanh pass; sigmoid(x) = 0.5*tanh(0.5x) + 0.5 --------------
    lane = jax.lax.broadcasted_iota(jnp.int32, gates.shape, 1)
    is_c = jnp.logical_and(lane >= 2 * H, lane < 3 * H)
    t = jnp.tanh(jnp.where(is_c, gates, 0.5 * gates))
    act = jnp.where(is_c, t, 0.5 * t + 0.5)                 # [f | i | c~ | o] along lanes

    f_g = act[:, 0 * H:1 * H]
    i_g = act[:, 1 * H:2 * H]
    c_t = act[:, 2 * H:3 * H]
    o_g = act[:, 3 * H:4 * H]

    c0 = data_ref[T + 1:T + 2, 0:H]                         # (1, H)
    cx = f_g * c0 + i_g * c_t                               # (T, H)

    # --- lnc: time-LayerNorm of the new cell state ------------------------------------------
    mu_c = jnp.mean(cx, axis=0, keepdims=True)
    d_c = cx - mu_c
    var_c = jnp.sum(d_c * d_c, axis=0, keepdims=True) * (1.0 / (T - 1))
    inv_c = pl.reciprocal(jnp.sqrt(var_c) + EPS, approx=False)
    cx_n = d_c * (inv_c * p_ref[4:5, 0:H]) + p_ref[5:6, 0:H]

    hx = o_g * jnp.tanh(cx_n)                               # (T, H)

    # --- packed lane-dense stores: rows 0..T-1 = [hx | cx | 0], row T = decoder output -----
    pieces = [hx, cx]
    if GW > 2 * H:
        pieces.append(jnp.zeros((T, GW - 2 * H), jnp.float32))
    o_ref[0:T, :] = jnp.concatenate(pieces, axis=1)

    out_row = jnp.dot(hx[T - 1:T, :], w_ref[I + H:I + 2 * H, :],
                      preferred_element_type=jnp.float32) + p_ref[6:7, :]
    o_ref[T:T + 1, :] = out_row


def _round_up(n, m):
    return ((n + m - 1) // m) * m


def make_params(key, input_size, hidden_size, output_size):
    """Deterministic synthetic parameters, faithful to the nn.Module's shapes."""
    H, I, O = hidden_size, input_size, output_size
    ks = jax.random.split(key, 18)
    scale_x = 1.0 / jnp.sqrt(I)
    scale_h = 1.0 / jnp.sqrt(H)

    def lin(kw, kb, n_in, n_out, s):
        w = jax.random.uniform(kw, (n_in, n_out), jnp.float32, -s, s)   # already (in, out)
        b = jax.random.uniform(kb, (1, n_out), jnp.float32, -s, s)
        return w, b

    # Gate order [f, i, c, o], fused along the output dim.
    wfx, bfx = lin(ks[0], ks[1], I, H, scale_x)
    wix, bix = lin(ks[2], ks[3], I, H, scale_x)
    wcx, bcx = lin(ks[4], ks[5], I, H, scale_x)
    wox, box = lin(ks[6], ks[7], I, H, scale_x)
    wfh, bfh = lin(ks[8], ks[9], H, H, scale_h)
    wih, bih = lin(ks[10], ks[11], H, H, scale_h)
    wch, bch = lin(ks[12], ks[13], H, H, scale_h)
    woh, boh = lin(ks[14], ks[15], H, H, scale_h)
    wd, bd = lin(ks[16], ks[17], H, O, scale_h)

    return {
        "wx": jnp.concatenate([wfx, wix, wcx, wox], axis=1),   # (I, 4H)
        "bx": jnp.concatenate([bfx, bix, bcx, box], axis=1),   # (1, 4H) (reference only)
        "wh": jnp.concatenate([wfh, wih, wch, woh], axis=1),   # (H, 4H)
        "bh": jnp.concatenate([bfh, bih, bch, boh], axis=1),   # (1, 4H)
        "a2x": jnp.ones((1, H), jnp.float32), "b2x": jnp.zeros((1, H), jnp.float32),
        "a2h": jnp.ones((1, H), jnp.float32), "b2h": jnp.zeros((1, H), jnp.float32),
        "a2c": jnp.ones((1, H), jnp.float32), "b2c": jnp.zeros((1, H), jnp.float32),
        "wd": wd, "bd": bd,
    }


def pack_params(params, input_size, hidden_size, output_size):
    """One-time packing of all weights/params into two lane-dense slabs (done once, not per call)."""
    I, H, O = input_size, hidden_size, output_size
    G = 4 * H
    GW = _round_up(max(G, O), 128)

    def lane_pad(a):
        return jnp.zeros((a.shape[0], GW), jnp.float32).at[:, :a.shape[1]].set(a)

    # Weight slab: fused gate weights [[wx],[wh]] then decoder weights, all at lane width GW.
    wslab = jnp.concatenate([lane_pad(params["wx"]),
                             lane_pad(params["wh"]),
                             lane_pad(params["wd"])], axis=0)             # (I+2H, GW)

    tile4 = lambda v: jnp.concatenate([v] * 4, axis=1)                     # (1,H)->(1,4H)
    pvec = jnp.concatenate([
        lane_pad(params["bh"]),                                            # row 0: fused bh
        lane_pad(tile4(params["a2x"])),                                    # row 1: lnx scale
        lane_pad(tile4(params["a2h"])),                                    # row 2: lnh scale
        lane_pad(tile4(params["b2x"]) + tile4(params["b2h"])),             # row 3: pre-summed shift
        lane_pad(params["a2c"]),                                           # row 4
        lane_pad(params["b2c"]),                                           # row 5
        lane_pad(params["bd"]),                                            # row 6
        jnp.zeros((1, GW), jnp.float32),                                   # row 7: pad to 8 sublanes
    ], axis=0)                                                             # (8, GW)

    return {"wslab": wslab, "pvec": pvec, "I": I, "H": H, "O": O, "GW": GW}


def lstm_forward(inp, h0, c0, packed):
    """inp: (1, T, I); h0, c0: (1, H). Returns (out (1,O), hx (1,T,H), cx (1,T,H))."""
    _, T, I = inp.shape
    H, O, GW = packed["H"], packed["O"], packed["GW"]
    assert I == packed["I"]
    assert T >= 2 and H >= 2, "unbiased (N-1) std requires T >= 2 and H >= 2"

    x = inp.reshape(T, I)
    # Per-call data slab (layout plumbing only): block-diag stack for the fused matmul + c0 row.
    data = jnp.zeros((T + 2, I + H), jnp.float32)
    data = data.at[0:T, 0:I].set(x)
    data = data.at[T, I:I + H].set(h0[0])
    data = data.at[T + 1, 0:H].set(c0[0])

    vmem = pl.BlockSpec(memory_space=pltpu.MemorySpace.VMEM)
    out_buf = pl.pallas_call(
        functools.partial(lstm_kernel, T=T, I=I, H=H),
        out_shape=jax.ShapeDtypeStruct((T + 1, GW), jnp.float32),
        in_specs=[vmem, vmem, vmem],
        out_specs=vmem,
    )(data, packed["wslab"], packed["pvec"])

    out = out_buf[T:T + 1, 0:O]
    hx = out_buf[0:T, 0:H].reshape(1, T, H)
    cx = out_buf[0:T, H:2 * H].reshape(1, T, H)
    return out, hx, cx


def ref_forward(inp, h0, c0, params):
    """Pure-JAX reference mirroring the PyTorch forward exactly (includes bx)."""
    _, T, I = inp.shape
    H = h0.shape[1]
    x = inp.reshape(T, I)
    gx = x @ params["wx"] + params["bx"]
    gh = h0 @ params["wh"] + params["bh"]

    def ln_t(z, a2, b2):
        mu = jnp.mean(z, axis=0, keepdims=True)
        sig = jnp.sqrt(jnp.sum((z - mu) ** 2, axis=0, keepdims=True) / (T - 1))
        return (z - mu) / (sig + EPS) * a2 + b2

    def ln_h(z, a2, b2):
        mu = jnp.mean(z, axis=1, keepdims=True)
        sig = jnp.sqrt(jnp.sum((z - mu) ** 2, axis=1, keepdims=True) / (H - 1))
        return (z - mu) / (sig + EPS) * a2 + b2

    sl = lambda g, k: g[:, k * H:(k + 1) * H]
    f = jax.nn.sigmoid(ln_t(sl(gx, 0), params["a2x"], params["b2x"]) + ln_h(sl(gh, 0), params["a2h"], params["b2h"]))
    i = jax.nn.sigmoid(ln_t(sl(gx, 1), params["a2x"], params["b2x"]) + ln_h(sl(gh, 1), params["a2h"], params["b2h"]))
    ct = jnp.tanh(ln_t(sl(gx, 2), params["a2x"], params["b2x"]) + ln_h(sl(gh, 2), params["a2h"], params["b2h"]))
    cx = f * c0 + i * ct
    o = jax.nn.sigmoid(ln_t(sl(gx, 3), params["a2x"], params["b2x"]) + ln_h(sl(gh, 3), params["a2h"], params["b2h"]))
    hx = o * jnp.tanh(ln_t(cx, params["a2c"], params["b2c"]))
    out = hx[T - 1:T, :] @ params["wd"] + params["bd"]
    return out, hx.reshape(1, T, H), cx.reshape(1, T, H)


if __name__ == "__main__":
    input_size, hidden_size, output_size = 8, 32, 4
    T = 8

    key = jax.random.PRNGKey(0)
    k_inp, k_h, k_c, k_par = jax.random.split(key, 4)
    inp = jax.random.normal(k_inp, (1, T, input_size), jnp.float32)
    h0 = jax.random.normal(k_h, (1, hidden_size), jnp.float32)
    c0 = jax.random.normal(k_c, (1, hidden_size), jnp.float32)

    params = make_params(k_par, input_size, hidden_size, output_size)
    packed = pack_params(params, input_size, hidden_size, output_size)   # once, not per call

    out, hx, cx = lstm_forward(inp, h0, c0, packed)
    jax.block_until_ready((out, hx, cx))

    # Sanity check against a pure-JAX reference of the PyTorch semantics.
    out_r, hx_r, cx_r = ref_forward(inp, h0, c0, params)
    assert jnp.allclose(out, out_r, rtol=1e-5, atol=1e-5)
    assert jnp.allclose(hx, hx_r, rtol=1e-5, atol=1e-5)
    assert jnp.allclose(cx, cx_r, rtol=1e-5, atol=1e-5)

    print("KERNEL_OK")
</pallas_src>

<mosaic_0001>
module attributes {stable_mosaic.version = 11 : i64} {
  func.func @lstm_kernel(%arg0: memref<10x40xf32, #tpu.memory_space<vmem>>, %arg1: memref<72x128xf32, #tpu.memory_space<vmem>>, %arg2: memref<8x128xf32, #tpu.memory_space<vmem>>, %arg3: memref<9x128xf32, #tpu.memory_space<vmem>>) attributes {dimension_semantics = [], scalar_prefetch = 0 : i64, scratch_operands = 0 : i64, tpu.core_type = #tpu.core_type<tc>} {
    %c0 = arith.constant 0 : index
    %c0_0 = arith.constant 0 : index
    %0 = vector.load %arg0[%c0, %c0_0] : memref<10x40xf32, #tpu.memory_space<vmem>>, vector<10x40xf32>
    %c0_1 = arith.constant 0 : index
    %c0_2 = arith.constant 0 : index
    %1 = vector.load %arg1[%c0_1, %c0_2] : memref<72x128xf32, #tpu.memory_space<vmem>>, vector<40x128xf32>
    %cst = arith.constant dense<0.000000e+00> : vector<10x128xf32>
    %2 = tpu.matmul %0, %1, %cst {dimension_numbers = #tpu.dot_dimension_numbers<[1], [0], [0], [1], [0, 0, 1, 1], [], []>} : vector<10x40xf32>, vector<40x128xf32>, vector<10x128xf32> -> vector<10x128xf32>
    %3 = vector.extract_strided_slice %2 {offsets = [0, 0], sizes = [8, 128], strides = [1, 1]} : vector<10x128xf32> to vector<8x128xf32>
    %4 = vector.extract_strided_slice %2 {offsets = [8, 0], sizes = [1, 128], strides = [1, 1]} : vector<10x128xf32> to vector<1x128xf32>
    %c0_3 = arith.constant 0 : index
    %c0_4 = arith.constant 0 : index
    %5 = vector.load %arg2[%c0_3, %c0_4] : memref<8x128xf32, #tpu.memory_space<vmem>>, vector<1x128xf32>
    %6 = arith.addf %4, %5 : vector<1x128xf32>
    %cst_5 = arith.constant dense<0.000000e+00> : vector<128xf32>
    %7 = vector.multi_reduction <add>, %3, %cst_5 [0] : vector<8x128xf32> to vector<128xf32>
    %8 = vector.shape_cast %7 : vector<128xf32> to vector<1x128xf32>
    %cst_6 = arith.constant 8.000000e+00 : f32
    %9 = vector.broadcast %cst_6 : f32 to vector<1x128xf32>
    %10 = arith.divf %8, %9 : vector<1x128xf32>
    %11 = vector.broadcast %10 : vector<1x128xf32> to vector<8x128xf32>
    %12 = arith.subf %3, %11 : vector<8x128xf32>
    %13 = arith.mulf %12, %12 : vector<8x128xf32>
    %cst_7 = arith.constant dense<0.000000e+00> : vector<128xf32>
    %14 = vector.multi_reduction <add>, %13, %cst_7 [0] : vector<8x128xf32> to vector<128xf32>
    %15 = vector.shape_cast %14 : vector<128xf32> to vector<1x128xf32>
    %cst_8 = arith.constant 0.142857149 : f32
    %16 = vector.broadcast %cst_8 : f32 to vector<1x128xf32>
    %17 = arith.mulf %15, %16 : vector<1x128xf32>
    %18 = math.sqrt %17 : vector<1x128xf32>
    %cst_9 = arith.constant 9.99999974E-6 : f32
    %19 = vector.broadcast %cst_9 : f32 to vector<1x128xf32>
    %20 = arith.addf %18, %19 : vector<1x128xf32>
    %21 = tpu.reciprocal %20 : vector<1x128xf32> -> vector<1x128xf32>
    %c1 = arith.constant 1 : index
    %c0_10 = arith.constant 0 : index
    %22 = vector.load %arg2[%c1, %c0_10] : memref<8x128xf32, #tpu.memory_space<vmem>>, vector<1x128xf32>
    %23 = arith.mulf %21, %22 : vector<1x128xf32>
    %24 = vector.broadcast %23 : vector<1x128xf32> to vector<8x128xf32>
    %25 = arith.mulf %12, %24 : vector<8x128xf32>
    %26 = vector.extract_strided_slice %6 {offsets = [0, 0], sizes = [1, 32], strides = [1, 1]} : vector<1x128xf32> to vector<1x32xf32>
    %cst_11 = arith.constant dense<0.000000e+00> : vector<1xf32>
    %27 = vector.multi_reduction <add>, %26, %cst_11 [1] : vector<1x32xf32> to vector<1xf32>
    %28 = vector.shape_cast %27 : vector<1xf32> to vector<1x1xf32>
    %cst_12 = arith.constant 3.200000e+01 : f32
    %29 = vector.broadcast %cst_12 : f32 to vector<1x1xf32>
    %30 = arith.divf %28, %29 : vector<1x1xf32>
    %31 = vector.broadcast %30 : vector<1x1xf32> to vector<1x32xf32>
    %32 = arith.subf %26, %31 : vector<1x32xf32>
    %33 = arith.mulf %32, %32 : vector<1x32xf32>
    %cst_13 = arith.constant dense<0.000000e+00> : vector<1xf32>
    %34 = vector.multi_reduction <add>, %33, %cst_13 [1] : vector<1x32xf32> to vector<1xf32>
    %35 = vector.shape_cast %34 : vector<1xf32> to vector<1x1xf32>
    %cst_14 = arith.constant 0.0322580636 : f32
    %36 = vector.broadcast %cst_14 : f32 to vector<1x1xf32>
    %37 = arith.mulf %35, %36 : vector<1x1xf32>
    %38 = math.sqrt %37 : vector<1x1xf32>
    %cst_15 = arith.constant 9.99999974E-6 : f32
    %39 = vector.broadcast %cst_15 : f32 to vector<1x1xf32>
    %40 = arith.addf %38, %39 : vector<1x1xf32>
    %41 = tpu.reciprocal %40 : vector<1x1xf32> -> vector<1x1xf32>
    %42 = vector.broadcast %41 : vector<1x1xf32> to vector<1x32xf32>
    %43 = arith.mulf %32, %42 : vector<1x32xf32>
    %44 = vector.extract_strided_slice %6 {offsets = [0, 32], sizes = [1, 32], strides = [1, 1]} : vector<1x128xf32> to vector<1x32xf32>
    %cst_16 = arith.constant dense<0.000000e+00> : vector<1xf32>
    %45 = vector.multi_reduction <add>, %44, %cst_16 [1] : vector<1x32xf32> to vector<1xf32>
    %46 = vector.shape_cast %45 : vector<1xf32> to vector<1x1xf32>
    %cst_17 = arith.constant 3.200000e+01 : f32
    %47 = vector.broadcast %cst_17 : f32 to vector<1x1xf32>
    %48 = arith.divf %46, %47 : vector<1x1xf32>
    %49 = vector.broadcast %48 : vector<1x1xf32> to vector<1x32xf32>
    %50 = arith.subf %44, %49 : vector<1x32xf32>
    %51 = arith.mulf %50, %50 : vector<1x32xf32>
    %cst_18 = arith.constant dense<0.000000e+00> : vector<1xf32>
    %52 = vector.multi_reduction <add>, %51, %cst_18 [1] : vector<1x32xf32> to vector<1xf32>
    %53 = vector.shape_cast %52 : vector<1xf32> to vector<1x1xf32>
    %cst_19 = arith.constant 0.0322580636 : f32
    %54 = vector.broadcast %cst_19 : f32 to vector<1x1xf32>
    %55 = arith.mulf %53, %54 : vector<1x1xf32>
    %56 = math.sqrt %55 : vector<1x1xf32>
    %cst_20 = arith.constant 9.99999974E-6 : f32
    %57 = vector.broadcast %cst_20 : f32 to vector<1x1xf32>
    %58 = arith.addf %56, %57 : vector<1x1xf32>
    %59 = tpu.reciprocal %58 : vector<1x1xf32> -> vector<1x1xf32>
    %60 = vector.broadcast %59 : vector<1x1xf32> to vector<1x32xf32>
    %61 = arith.mulf %50, %60 : vector<1x32xf32>
    %62 = vector.extract_strided_slice %6 {offsets = [0, 64], sizes = [1, 32], strides = [1, 1]} : vector<1x128xf32> to vector<1x32xf32>
    %cst_21 = arith.constant dense<0.000000e+00> : vector<1xf32>
    %63 = vector.multi_reduction <add>, %62, %cst_21 [1] : vector<1x32xf32> to vector<1xf32>
    %64 = vector.shape_cast %63 : vector<1xf32> to vector<1x1xf32>
    %cst_22 = arith.constant 3.200000e+01 : f32
    %65 = vector.broadcast %cst_22 : f32 to vector<1x1xf32>
    %66 = arith.divf %64, %65 : vector<1x1xf32>
    %67 = vector.broadcast %66 : vector<1x1xf32> to vector<1x32xf32>
    %68 = arith.subf %62, %67 : vector<1x32xf32>
    %69 = arith.mulf %68, %68 : vector<1x32xf32>
    %cst_23 = arith.constant dense<0.000000e+00> : vector<1xf32>
    %70 = vector.multi_reduction <add>, %69, %cst_23 [1] : vector<1x32xf32> to vector<1xf32>
    %71 = vector.shape_cast %70 : vector<1xf32> to vector<1x1xf32>
    %cst_24 = arith.constant 0.0322580636 : f32
    %72 = vector.broadcast %cst_24 : f32 to vector<1x1xf32>
    %73 = arith.mulf %71, %72 : vector<1x1xf32>
    %74 = math.sqrt %73 : vector<1x1xf32>
    %cst_25 = arith.constant 9.99999974E-6 : f32
    %75 = vector.broadcast %cst_25 : f32 to vector<1x1xf32>
    %76 = arith.addf %74, %75 : vector<1x1xf32>
    %77 = tpu.reciprocal %76 : vector<1x1xf32> -> vector<1x1xf32>
    %78 = vector.broadcast %77 : vector<1x1xf32> to vector<1x32xf32>
    %79 = arith.mulf %68, %78 : vector<1x32xf32>
    %80 = vector.extract_strided_slice %6 {offsets = [0, 96], sizes = [1, 32], strides = [1, 1]} : vector<1x128xf32> to vector<1x32xf32>
    %cst_26 = arith.constant dense<0.000000e+00> : vector<1xf32>
    %81 = vector.multi_reduction <add>, %80, %cst_26 [1] : vector<1x32xf32> to vector<1xf32>
    %82 = vector.shape_cast %81 : vector<1xf32> to vector<1x1xf32>
    %cst_27 = arith.constant 3.200000e+01 : f32
    %83 = vector.broadcast %cst_27 : f32 to vector<1x1xf32>
    %84 = arith.divf %82, %83 : vector<1x1xf32>
    %85 = vector.broadcast %84 : vector<1x1xf32> to vector<1x32xf32>
    %86 = arith.subf %80, %85 : vector<1x32xf32>
    %87 = arith.mulf %86, %86 : vector<1x32xf32>
    %cst_28 = arith.constant dense<0.000000e+00> : vector<1xf32>
    %88 = vector.multi_reduction <add>, %87, %cst_28 [1] : vector<1x32xf32> to vector<1xf32>
    %89 = vector.shape_cast %88 : vector<1xf32> to vector<1x1xf32>
    %cst_29 = arith.constant 0.0322580636 : f32
    %90 = vector.broadcast %cst_29 : f32 to vector<1x1xf32>
    %91 = arith.mulf %89, %90 : vector<1x1xf32>
    %92 = math.sqrt %91 : vector<1x1xf32>
    %cst_30 = arith.constant 9.99999974E-6 : f32
    %93 = vector.broadcast %cst_30 : f32 to vector<1x1xf32>
    %94 = arith.addf %92, %93 : vector<1x1xf32>
    %95 = tpu.reciprocal %94 : vector<1x1xf32> -> vector<1x1xf32>
    %96 = vector.broadcast %95 : vector<1x1xf32> to vector<1x32xf32>
    %97 = arith.mulf %86, %96 : vector<1x32xf32>
    %98 = tpu.concatenate %43, %61, %79, %97 in 1 : vector<1x32xf32>, vector<1x32xf32>, vector<1x32xf32>, vector<1x32xf32> -> vector<1x128xf32>
    %c2 = arith.constant 2 : index
    %c0_31 = arith.constant 0 : index
    %99 = vector.load %arg2[%c2, %c0_31] : memref<8x128xf32, #tpu.memory_space<vmem>>, vector<1x128xf32>
    %100 = arith.mulf %98, %99 : vector<1x128xf32>
    %101 = vector.broadcast %100 : vector<1x128xf32> to vector<8x128xf32>
    %102 = arith.addf %25, %101 : vector<8x128xf32>
    %c3 = arith.constant 3 : index
    %c0_32 = arith.constant 0 : index
    %103 = vector.load %arg2[%c3, %c0_32] : memref<8x128xf32, #tpu.memory_space<vmem>>, vector<1x128xf32>
    %104 = vector.broadcast %103 : vector<1x128xf32> to vector<8x128xf32>
    %105 = arith.addf %102, %104 : vector<8x128xf32>
    %106 = tpu.iota {dimensions = array<i32: 1>} : vector<8x128xi32>
    %c64_i32 = arith.constant 64 : i32
    %107 = vector.broadcast %c64_i32 : i32 to vector<8x128xi32>
    %108 = arith.cmpi sge, %106, %107 : vector<8x128xi32>
    %c96_i32 = arith.constant 96 : i32
    %109 = vector.broadcast %c96_i32 : i32 to vector<8x128xi32>
    %110 = arith.cmpi slt, %106, %109 : vector<8x128xi32>
    %111 = arith.andi %108, %110 : vector<8x128xi1>
    %cst_33 = arith.constant 5.000000e-01 : f32
    %112 = vector.broadcast %cst_33 : f32 to vector<8x128xf32>
    %113 = arith.mulf %112, %105 : vector<8x128xf32>
    %114 = arith.select %111, %105, %113 : vector<8x128xi1>, vector<8x128xf32>
    %115 = math.tanh %114 : vector<8x128xf32>
    %cst_34 = arith.constant 5.000000e-01 : f32
    %116 = vector.broadcast %cst_34 : f32 to vector<8x128xf32>
    %117 = arith.mulf %116, %115 : vector<8x128xf32>
    %cst_35 = arith.constant 5.000000e-01 : f32
    %118 = vector.broadcast %cst_35 : f32 to vector<8x128xf32>
    %119 = arith.addf %117, %118 : vector<8x128xf32>
    %120 = arith.select %111, %115, %119 : vector<8x128xi1>, vector<8x128xf32>
    %121 = vector.extract_strided_slice %120 {offsets = [0, 0], sizes = [8, 32], strides = [1, 1]} : vector<8x128xf32> to vector<8x32xf32>
    %122 = vector.extract_strided_slice %120 {offsets = [0, 32], sizes = [8, 32], strides = [1, 1]} : vector<8x128xf32> to vector<8x32xf32>
    %123 = vector.extract_strided_slice %120 {offsets = [0, 64], sizes = [8, 32], strides = [1, 1]} : vector<8x128xf32> to vector<8x32xf32>
    %124 = vector.extract_strided_slice %120 {offsets = [0, 96], sizes = [8, 32], strides = [1, 1]} : vector<8x128xf32> to vector<8x32xf32>
    %c9 = arith.constant 9 : index
    %c0_36 = arith.constant 0 : index
    %125 = vector.load %arg0[%c9, %c0_36] : memref<10x40xf32, #tpu.memory_space<vmem>>, vector<1x32xf32>
    %126 = vector.broadcast %125 : vector<1x32xf32> to vector<8x32xf32>
    %127 = arith.mulf %121, %126 : vector<8x32xf32>
    %128 = arith.mulf %122, %123 : vector<8x32xf32>
    %129 = arith.addf %127, %128 : vector<8x32xf32>
    %cst_37 = arith.constant dense<0.000000e+00> : vector<32xf32>
    %130 = vector.multi_reduction <add>, %129, %cst_37 [0] : vector<8x32xf32> to vector<32xf32>
    %131 = vector.shape_cast %130 : vector<32xf32> to vector<1x32xf32>
    %cst_38 = arith.constant 8.000000e+00 : f32
    %132 = vector.broadcast %cst_38 : f32 to vector<1x32xf32>
    %133 = arith.divf %131, %132 : vector<1x32xf32>
    %134 = vector.broadcast %133 : vector<1x32xf32> to vector<8x32xf32>
    %135 = arith.subf %129, %134 : vector<8x32xf32>
    %136 = arith.mulf %135, %135 : vector<8x32xf32>
    %cst_39 = arith.constant dense<0.000000e+00> : vector<32xf32>
    %137 = vector.multi_reduction <add>, %136, %cst_39 [0] : vector<8x32xf32> to vector<32xf32>
    %138 = vector.shape_cast %137 : vector<32xf32> to vector<1x32xf32>
    %cst_40 = arith.constant 0.142857149 : f32
    %139 = vector.broadcast %cst_40 : f32 to vector<1x32xf32>
    %140 = arith.mulf %138, %139 : vector<1x32xf32>
    %141 = math.sqrt %140 : vector<1x32xf32>
    %cst_41 = arith.constant 9.99999974E-6 : f32
    %142 = vector.broadcast %cst_41 : f32 to vector<1x32xf32>
    %143 = arith.addf %141, %142 : vector<1x32xf32>
    %144 = tpu.reciprocal %143 : vector<1x32xf32> -> vector<1x32xf32>
    %c4 = arith.constant 4 : index
    %c0_42 = arith.constant 0 : index
    %145 = vector.load %arg2[%c4, %c0_42] : memref<8x128xf32, #tpu.memory_space<vmem>>, vector<1x32xf32>
    %146 = arith.mulf %144, %145 : vector<1x32xf32>
    %147 = vector.broadcast %146 : vector<1x32xf32> to vector<8x32xf32>
    %148 = arith.mulf %135, %147 : vector<8x32xf32>
    %c5 = arith.constant 5 : index
    %c0_43 = arith.constant 0 : index
    %149 = vector.load %arg2[%c5, %c0_43] : memref<8x128xf32, #tpu.memory_space<vmem>>, vector<1x32xf32>
    %150 = vector.broadcast %149 : vector<1x32xf32> to vector<8x32xf32>
    %151 = arith.addf %148, %150 : vector<8x32xf32>
    %152 = math.tanh %151 : vector<8x32xf32>
    %153 = arith.mulf %124, %152 : vector<8x32xf32>
    %cst_44 = arith.constant 0.000000e+00 : f32
    %154 = vector.broadcast %cst_44 : f32 to vector<8x64xf32>
    %155 = tpu.concatenate %153, %129, %154 in 1 : vector<8x32xf32>, vector<8x32xf32>, vector<8x64xf32> -> vector<8x128xf32>
    %c0_45 = arith.constant 0 : index
    %c0_46 = arith.constant 0 : index
    %156 = vector.load %arg3[%c0_45, %c0_46] : memref<9x128xf32, #tpu.memory_space<vmem>>, vector<8x128xf32>
    tpu.vector_store %arg3[%c0_45, %c0_46], %155 {strides = array<i32>} : memref<9x128xf32, #tpu.memory_space<vmem>>, vector<8x128xf32>,
    %157 = vector.extract_strided_slice %153 {offsets = [7, 0], sizes = [1, 32], strides = [1, 1]} : vector<8x32xf32> to vector<1x32xf32>
    %c40 = arith.constant 40 : index
    %c0_47 = arith.constant 0 : index
    %158 = vector.load %arg1[%c40, %c0_47] : memref<72x128xf32, #tpu.memory_space<vmem>>, vector<32x128xf32>
    %cst_48 = arith.constant dense<0.000000e+00> : vector<1x128xf32>
    %159 = tpu.matmul %157, %158, %cst_48 {dimension_numbers = #tpu.dot_dimension_numbers<[1], [0], [0], [1], [0, 0, 1, 1], [], []>} : vector<1x32xf32>, vector<32x128xf32>, vector<1x128xf32> -> vector<1x128xf32>
    %c6 = arith.constant 6 : index
    %c0_49 = arith.constant 0 : index
    %160 = vector.load %arg2[%c6, %c0_49] : memref<8x128xf32, #tpu.memory_space<vmem>>, vector<1x128xf32>
    %161 = arith.addf %159, %160 : vector<1x128xf32>
    %c8 = arith.constant 8 : index
    %c0_50 = arith.constant 0 : index
    %162 = vector.load %arg3[%c8, %c0_50] : memref<9x128xf32, #tpu.memory_space<vmem>>, vector<1x128xf32>
    tpu.vector_store %arg3[%c8, %c0_50], %161 {strides = array<i32>} : memref<9x128xf32, #tpu.memory_space<vmem>>, vector<1x128xf32>,
    return
  }
}

</mosaic_0001>

<bundles_post_ra>
// kernel: tpu_custom_call.1
= control target key start
LH: loop header
LB: loop body
LE: loop exit
PB: predicated region body
PF: predicated region fallthrough
CT: control target
= control target key end

     0   :  { %8 = vsyncpa [#allocation3], 0  ;;  %s766_s0 = inlined_call_operand.hbm [shape: f32[10,40], index: 0, kind: input, shape index: {}]   ;;  %s767_s1 = inlined_call_operand.hbm [shape: f32[72,128], index: 1, kind: input, shape index: {}]   ;;  %s768_s2 = inlined_call_operand.hbm [shape: f32[8,128], index: 2, kind: input, shape index: {}]   ;;  %s769_s3 = inlined_call_operand.hbm [shape: f32[9,128], index: 3, kind: output, shape index: {}]  }
   0x1   :  { %9 = vsyncpa [#allocation6], 0 }
   0x2   :  { %10 = vsyncpa [#allocation4], 0  ;;  %s651_s12 = smov [#allocation5]   ;;  %s652_s14 = smov [#allocation2]  }
   0x3   :  { %s28_s13 = sshll.u32 %s651_s12, 4  ;;  %s16_s15 = sshll.u32 %s652_s14, 4  ;;  %s29_s13 = int_to_ptr.vmem [resolvable:$true] %s28_s13  ;;  %s17_s15 = int_to_ptr.vmem [resolvable:$true] %s16_s15 }
   0x4   :  { %s573_s16 = scalar_lea.vmem %s29_s13, 1152  ;;  %p578_p1 = scmp.lt.s32.totalorder %s29_s13, %s29_s13 }
   0x5   :  { %p574_p0 = scmp.ne.s32.totalorder %s29_s13, %s573_s16  ;;  %p579_p2 = scmp.lt.s32.totalorder %s573_s16, %s573_s16 }
   0x7   :  { %p580_p3 = por %p579_p2, %p578_p1 }
   0x9   :  { %p581_p4 = pnand %p580_p3, %p574_p0 }
   0xb   :  { %584 = shalt.err (!%p581_p4)
}
   0xc   :  { %s653_s17 = smov 128   ;;  %s654_s18 = smov 8  }
   0xd   :  { %34 = dma.hbm_to_vmem [thread:$0]  %s767_s1, 1152, %s29_s13, [#allocation6], %s653_s17, %s653_s17, %s654_s18  }
   0xe   :  { %s593_s21 = scalar_lea.vmem %s17_s15, 256  ;;  %p598_p6 = scmp.lt.s32.totalorder %s17_s15, %s17_s15 }
   0xf   :  { %p594_p5 = scmp.ne.s32.totalorder %s17_s15, %s593_s21  ;;  %p599_p7 = scmp.lt.s32.totalorder %s593_s21, %s593_s21 }
  0x11   :  { %p600_p8 = por %p599_p7, %p598_p6 }
  0x13   :  { %p601_p9 = pnand %p600_p8, %p594_p5 }
  0x15   :  { %604 = shalt.err (!%p601_p9)
}
  0x16   :  { %22 = dma.hbm_to_vmem [thread:$0]  %s766_s0, 256, %s17_s15, [#allocation3], %s653_s17, %s653_s17, %s654_s18  }
  0x17   :  { %s655_s24 = smov [#allocation7]  }
  0x18   :  { %s41_s25 = sshll.u32 %s655_s24, 4  ;;  %s42_s25 = int_to_ptr.vmem [resolvable:$true] %s41_s25 }
  0x19   :  { %s613_s26 = scalar_lea.vmem %s42_s25, 128  ;;  %p618_p11 = scmp.lt.s32.totalorder %s42_s25, %s42_s25 }
  0x1a   :  { %p614_p10 = scmp.ne.s32.totalorder %s42_s25, %s613_s26  ;;  %p619_p12 = scmp.lt.s32.totalorder %s613_s26, %s613_s26 }
  0x1c   :  { %p620_p13 = por %p619_p12, %p618_p11 }
  0x1e   :  { %p621_p0 = pnand %p620_p13, %p614_p10 }
  0x20   :  { %624 = shalt.err (!%p621_p0)
}
  0x21   :  { %44 = dma.hbm_to_vmem [thread:$0]  %s768_s2, 128, %s42_s25, [#allocation6]  }
  0x22   :  { %645 = dma.done.wait [#allocation3], 256  }
  0x23   :  { %646 = vsyncadd [#allocation3], 4294967040 }
  0x24   :  { %647 = dma.done.wait [#allocation6], 1280  }
  0x25   :  { %648 = vsyncadd [#allocation6], 4294966016  ;;  %vm61_vm0 = vcmask 326656   ;;  %v60_v0 = vld [vmem:[#allocation5 + $0x20] sm:$0xff]  ;;  %v59_v1 = vld [vmem:[#allocation5 + $0x18] sm:$0xff]  ;;  %s656_s0 = smov 32  }
  0x26   :  { %502 = vmatprep.subr.mxu0 %v60_v0  ;;  %v54_v2 = vld [vmem:[#allocation2] sm:$0xff]  ;;  %v57_v4 = vld [vmem:[#allocation5 + $0x8] sm:$0xff]  ;;  %v56_v5 = vld [vmem:[#allocation5] sm:$0xff]  ;;  %s657_s2 = smov 96   ;;  %s658_s28 = smov 64   ;;  %vm178_vm1 = vcmask 253952  }
  0x27   :  { %503 = vmatpush3.msra.mxu0 %v60_v0  ;;  %v58_v3 = vld [vmem:[#allocation5 + $0x10] sm:$0xff]  ;;  %512 = vmatprep.mubr.msk.f32.mxu0 %vm61_vm0, %v54_v2  ;;  %v55_v6 = vld [vmem:[#allocation2 + $0x8] sm:$0x3]  ;;  %v143_v7 = vld [vmem:[#allocation7] sm:$0x1]  ;;  %vm282_vm12 = vcmask 261120  }
  0x28   :  { %504 = vmatprep.subr.mxu0 %v59_v1  ;;  %vm284_vm13 = vcmask 523264   ;;  %vm286_vm14 = vcmask 785408   ;;  %s661_s29 = smov [#allocation8]  }
  0x29   :  { %505 = vmatpush3.msra.mxu0 %v59_v1  ;;  %s471_s30 = sshll.u32 %s661_s29, 4  ;;  %s472_s30 = int_to_ptr.vmem [resolvable:$true] %s471_s30 }
  0x2a   :  { %506 = vmatprep.subr.mxu0 %v58_v3  ;;  %s625_s4 = scalar_lea.vmem %s472_s30, 256  ;;  %p630_p2 = scmp.lt.s32.totalorder %s472_s30, %s472_s30 }
  0x2b   :  { %507 = vmatpush3.msra.mxu0 %v58_v3  ;;  %p626_p1 = scmp.ne.s32.totalorder %s472_s30, %s625_s4  ;;  %p631_p3 = scmp.lt.s32.totalorder %s625_s4, %s625_s4 }
  0x2c   :  { %508 = vmatprep.subr.mxu0 %v57_v4 }
  0x2d   :  { %509 = vmatpush3.msra.mxu0 %v57_v4  ;;  %p632_p4 = por %p631_p3, %p630_p2 }
  0x2e   :  { %510 = vmatprep.subr.mxu0 %v56_v5 }
  0x2f   :  { %511 = vmatpush3.msra.mxu0 %v56_v5  ;;  %p633_p5 = pnand %p632_p4, %p626_p1 }
  0x30   :  { %513 = vmatmul.mubr.msk.f32.vlgmr.msra.gmra.mxu0 %vm61_vm0, %v55_v6 }
  0xf0   :  { %v514_v8 = vpop.f32.mrf.mxu0 }
  0xf1   :  { %v144_v9 = vadd.f32 %v514_v8, %v143_v7 }
  0xf2   :  { %v134_v40 = vpop.f32.mrf.mxu0 }
  0xf3   :  { %255 = vrot.lane.b32.xlu1 %v144_v9, %s656_s0  ;;  %201 = vrot.lane.b32.xlu0 %v144_v9, %s657_s2  ;;  %v179_v14 = vsel %vm178_vm1, %v144_v9, 0.0  ;;  %v145_v41 = vrot.slane %v134_v40, 4 }
  0xf5   :  { %v146_v42 = vadd.f32 %v145_v41, %v134_v40 }
  0xf7   :  { %228 = vrot.lane.b32.xlu0 %v144_v9, %s658_s28  ;;  %v147_v43 = vrot.slane %v146_v42, 2 }
  0xf9   :  { %v148_v44 = vadd.f32 %v147_v43, %v146_v42 }
  0xfb   :  { %v149_v45 = vrot.slane %v148_v44, 1 }
  0xfd   :  { %v150_v46 = vadd.f32 %v149_v45, %v148_v44 }
  0xff   :  { %v152_v47 = vmul.f32 0.125, %v150_v46 }
 0x101   :  { %v727_v48 = vsub.f32 %v134_v40, %v152_v47  ;;  %v171_v40 = vld [vmem:[#allocation7 + $0x1] sm:$0x1] }
 0x103   :  { %v154_v49 = vmul.f32 %v727_v48, %v727_v48 }
 0x105   :  { %v155_v50 = vrot.slane %v154_v49, 4 }
 0x107   :  { %v156_v51 = vadd.f32 %v155_v50, %v154_v49 }
 0x109   :  { %v157_v52 = vrot.slane %v156_v51, 2 }
 0x10b   :  { %v158_v53 = vadd.f32 %v157_v52, %v156_v51  ;;  %v288_v51 = vld [vmem:[#allocation7 + $0x2] sm:$0x1] }
 0x10d   :  { %v159_v54 = vrot.slane %v158_v53, 1 }
 0x10f   :  { %v160_v55 = vadd.f32 %v159_v54, %v158_v53 }
 0x111   :  { %v161_v57 = vmul.f32 0.14285715, %v160_v55 }
 0x113   :  { %537 = vrsqrt.f32 %v161_v57  ;;  %vm164_vm2 = vcmp.eq.f32.partialorder %v161_v57, inf  ;;  %v167_v6 = vand.u32 2147483648, %v161_v57  ;;  %vm166_vm4 = vcmp.eq.f32.partialorder %v161_v57, 0.0 }
 0x120   :  { %v538_v63 = vpop.eup %537 }
 0x121   :  { %v163_v3 = vmul.f32 %v538_v63, %v161_v57 }
 0x123   :  { %v165_v5 = vsel %vm164_vm2, %v161_v57, %v163_v3 }
 0x165   :  { %v202_v10 = vpop.permute.xlu0 %201  ;;  %v256_v15 = vpop.permute.xlu1 %255 }
 0x166   :  { %v204_v11 = vsel %vm178_vm1, %v202_v10, 0.0  ;;  %v258_v16 = vsel %vm178_vm1, %v256_v15, 0.0 }
 0x167   :  { %205 = vadd.xlane.f32.xlu1 %v204_v11 }
 0x169   :  { %v229_v12 = vpop.permute.xlu0 %228 }
 0x16a   :  { %v231_v13 = vsel %vm178_vm1, %v229_v12, 0.0 }
 0x16b   :  { %232 = vadd.xlane.f32.xlu0 %v231_v13  ;;  %180 = vadd.xlane.f32.xlu1 %v179_v14 }
 0x16f   :  { %259 = vadd.xlane.f32.xlu0 %v258_v16 }
 0x1f0   :  { %v206_v17 = vpop.xlane.xlu1 %205 }
 0x1f1   :  { %v207_v18 = vmul.f32 0.03125, %v206_v17 }
 0x1f3   :  { %v705_v19 = vsub.f32 %v144_v9, %v207_v18 }
 0x1f4   :  { %v233_v20 = vpop.xlane.xlu0 %232  ;;  %v181_v29 = vpop.xlane.xlu1 %180 }
 0x1f5   :  { %v234_v21 = vmul.f32 0.03125, %v233_v20  ;;  %v209_v22 = vmul.f32 %v705_v19, %v705_v19  ;;  %v183_v30 = vmul.f32 0.03125, %v181_v29 }
 0x1f7   :  { %v709_v23 = vsub.f32 %v144_v9, %v234_v21  ;;  %211 = vrot.lane.b32.xlu0 %v209_v22, %s657_s2  ;;  %v719_v31 = vsub.f32 %v144_v9, %v183_v30 }
 0x1f8   :  { %v260_v24 = vpop.xlane.xlu0 %259 }
 0x1f9   :  { %v261_v25 = vmul.f32 0.03125, %v260_v24  ;;  %v236_v26 = vmul.f32 %v709_v23, %v709_v23  ;;  %v185_v32 = vmul.f32 %v719_v31, %v719_v31 }
 0x1fb   :  { %v714_v27 = vsub.f32 %v144_v9, %v261_v25  ;;  %238 = vrot.lane.b32.xlu1 %v236_v26, %s658_s28  ;;  %v186_v33 = vsel %vm178_vm1, %v185_v32, 0.0  ;;  %v168_v9 = vsel %vm166_vm4, %v167_v6, %v165_v5  ;;  %vm660_vm4 = vmmov 0  }
 0x1fc   :  { %v169_v16 = vadd.f32 1e-05, %v168_v9 }
 0x1fd   :  { %v263_v28 = vmul.f32 %v714_v27, %v714_v27 }
 0x1ff   :  { %265 = vrot.lane.b32.xlu1 %v263_v28, %s656_s0 }
 0x216   :  { %187 = vadd.xlane.f32.xlu0 %v186_v33 }
 0x269   :  { %v212_v34 = vpop.permute.xlu0 %211 }
 0x26a   :  { %v214_v35 = vsel %vm178_vm1, %v212_v34, 0.0 }
 0x26b   :  { %215 = vadd.xlane.f32.xlu1 %v214_v35  ;;  %v173_v35 = vlaneseq }
 0x26d   :  { %v239_v36 = vpop.permute.xlu1 %238  ;;  %v302_v55 = vand.u32 127, %v173_v35 }
 0x26e   :  { %v241_v37 = vsel %vm178_vm1, %v239_v36, 0.0 }
 0x26f   :  { %242 = vadd.xlane.f32.xlu0 %v241_v37  ;;  %vm303_vm15 = vcmp.ge.s32.totalorder %v302_v55, 64  ;;  %vm304_vm0 = vcmp.lt.s32.totalorder %v302_v55, 96 }
 0x271   :  { %v266_v38 = vpop.permute.xlu1 %265 }
 0x272   :  { %v268_v39 = vsel %vm178_vm1, %v266_v38, 0.0  ;;  %v174_v38 = vshrl.u32 %v173_v35, 7  ;;  %vm305_vm1 = vmand %vm303_vm15, %vm304_vm0 }
 0x273   :  { %269 = vadd.xlane.f32.xlu0 %v268_v39 }
 0x274   :  { %v732_v44 = vsub.s32 0, %v174_v38 }
 0x29f   :  { %v188_v56 = vpop.xlane.xlu0 %187 }
 0x2a0   :  { %v189_v58 = vmul.f32 0.032258064, %v188_v56 }
 0x2a2   :  { %539 = vrsqrt.f32 %v189_v58  ;;  %vm192_vm3 = vcmp.eq.f32.partialorder %v189_v58, inf  ;;  %v195_v10 = vand.u32 2147483648, %v189_v58  ;;  %vm194_vm5 = vcmp.eq.f32.partialorder %v189_v58, 0.0 }
 0x2af   :  { %v540_v1 = vpop.eup %539 }
 0x2b0   :  { %v191_v4 = vmul.f32 %v540_v1, %v189_v58  ;;  %v487_v1 = vld [vmem:[#allocation2 + $0x9] ss:$0 sm:$0xff] }
 0x2b2   :  { %v193_v8 = vsel %vm192_vm3, %v189_v58, %v191_v4 }
 0x2b3   :  { %v196_v13 = vsel %vm194_vm5, %v195_v10, %v193_v8 }
 0x2b4   :  { %v197_v21 = vadd.f32 1e-05, %v196_v13 }
 0x2f4   :  { %v216_v59 = vpop.xlane.xlu1 %215 }
 0x2f5   :  { %v217_v60 = vmul.f32 0.032258064, %v216_v59 }
 0x2f7   :  { %541 = vrsqrt.f32 %v217_v60  ;;  %vm220_vm6 = vcmp.eq.f32.partialorder %v217_v60, inf  ;;  %v223_v12 = vand.u32 2147483648, %v217_v60  ;;  %vm222_vm7 = vcmp.eq.f32.partialorder %v217_v60, 0.0 }
 0x2f8   :  { %v243_v61 = vpop.xlane.xlu0 %242 }
 0x2f9   :  { %v244_v62 = vmul.f32 0.032258064, %v243_v61 }
 0x2fb   :  { %543 = vrsqrt.f32 %v244_v62  ;;  %vm247_vm8 = vcmp.eq.f32.partialorder %v244_v62, inf  ;;  %v250_v22 = vand.u32 2147483648, %v244_v62  ;;  %vm249_vm9 = vcmp.eq.f32.partialorder %v244_v62, 0.0 }
 0x2fc   :  { %v270_v0 = vpop.xlane.xlu0 %269 }
 0x2fd   :  { %v271_v2 = vmul.f32 0.032258064, %v270_v0 }
 0x2ff   :  { %545 = vrsqrt.f32 %v271_v2  ;;  %vm274_vm10 = vcmp.eq.f32.partialorder %v271_v2, inf  ;;  %v277_v30 = vand.u32 2147483648, %v271_v2  ;;  %vm276_vm11 = vcmp.eq.f32.partialorder %v271_v2, 0.0 }
 0x300   :  { %547 = vrcp.f32 %v169_v16 }
 0x304   :  { %v542_v7 = vpop.eup %541 }
 0x305   :  { %v219_v11 = vmul.f32 %v542_v7, %v217_v60 }
 0x307   :  { %v221_v14 = vsel %vm220_vm6, %v217_v60, %v219_v11 }
 0x308   :  { %v544_v15 = vpop.eup %543  ;;  %v224_v17 = vsel %vm222_vm7, %v223_v12, %v221_v14 }
 0x309   :  { %v225_v18 = vadd.f32 1e-05, %v224_v17  ;;  %v246_v20 = vmul.f32 %v544_v15, %v244_v62 }
 0x30b   :  { %v248_v24 = vsel %vm247_vm8, %v244_v62, %v246_v20  ;;  %549 = vrcp.f32 %v225_v18 }
 0x30c   :  { %v546_v25 = vpop.eup %545  ;;  %v251_v26 = vsel %vm249_vm9, %v250_v22, %v248_v24  ;;  %551 = vrcp.f32 %v197_v21 }
 0x30d   :  { %v252_v28 = vadd.f32 1e-05, %v251_v26  ;;  %v273_v29 = vmul.f32 %v546_v25, %v271_v2  ;;  %v548_v36 = vpop.eup %547 }
 0x30e   :  { %v172_v43 = vmul.f32 %v548_v36, %v171_v40  ;;  %v388_v40 = vld [vmem:[#allocation5 + $0x40] sm:$0xff] }
 0x30f   :  { %553 = vrcp.f32 %v252_v28  ;;  %v275_v32 = vsel %vm274_vm10, %v271_v2, %v273_v29 }
 0x310   :  { %v278_v33 = vsel %vm276_vm11, %v277_v30, %v275_v32  ;;  %v176_v52 = vrot.slane %v172_v43, %v732_v44  ;;  %v386_v43 = vld [vmem:[#allocation5 + $0x30] sm:$0xff] }
 0x311   :  { %v279_v34 = vadd.f32 1e-05, %v278_v33  ;;  %v355_v33 = vld [vmem:[#allocation7 + $0x4] sm:$0x1] }
 0x313   :  { %555 = vrcp.f32 %v279_v34 }
 0x318   :  { %v550_v37 = vpop.eup %549 }
 0x319   :  { %v552_v39 = vpop.eup %551  ;;  %v227_v42 = vmul.f32 %v550_v37, %v705_v19  ;;  %v488_v37 = vld [vmem:[#allocation7 + $0x5] ss:$0 sm:$0xff] }
 0x31a   :  { %v199_v46 = vmul.f32 %v552_v39, %v719_v31  ;;  %v486_v31 = vld [vmem:[#allocation7 + $0x3] ss:$0 sm:$0xff] }
 0x31c   :  { %v554_v41 = vpop.eup %553  ;;  %v283_v50 = vsel %vm282_vm12, %v199_v46, %v227_v42  ;;  %v387_v42 = vld [vmem:[#allocation5 + $0x38] sm:$0xff]  ;;  %v385_v46 = vld [vmem:[#allocation5 + $0x28] sm:$0xff] }
 0x31d   :  { %v254_v45 = vmul.f32 %v554_v41, %v709_v23  ;;  %v177_v23 = vmul.f32 %v176_v52, %v727_v48  ;;  %v659_v41 = vmov 0.0  }
 0x31e   :  { %515 = vmatprep.subr.mxu1 %v659_v41  ;;  %523 = vmatprep.mubr.msk.f32.mxu1 %vm660_vm4, %v659_v41 }
 0x31f   :  { %v285_v19 = vsel %vm284_vm13, %v283_v50, %v254_v45  ;;  %516 = vmatpush3.msra.mxu1 %v388_v40 }
 0x320   :  { %v556_v47 = vpop.eup %555  ;;  %517 = vmatprep.subr.mxu1 %v659_v41 }
 0x321   :  { %v281_v49 = vmul.f32 %v556_v47, %v714_v27  ;;  %518 = vmatpush3.msra.mxu1 %v387_v42 }
 0x322   :  { %519 = vmatprep.subr.mxu1 %v659_v41 }
 0x323   :  { %v287_v53 = vsel %vm286_vm14, %v285_v19, %v281_v49  ;;  %520 = vmatpush3.msra.mxu1 %v386_v43 }
 0x324   :  { %v289_v54 = vmul.f32 %v288_v51, %v287_v53  ;;  %521 = vmatprep.subr.mxu1 %v659_v41 }
 0x325   :  { %522 = vmatpush3.msra.mxu1 %v385_v46 }
 0x326   :  { %v293_v56 = vrot.slane %v289_v54, %v732_v44  ;;  %v389_v54 = vld [vmem:[#allocation7 + $0x6] sm:$0x1] }
 0x328   :  { %v294_v57 = vadd.f32 %v293_v56, %v177_v23 }
 0x32a   :  { %v300_v58 = vadd.f32 %v486_v31, %v294_v57 }
 0x32c   :  { %v306_v27 = vmul.f32 0.5, %v300_v58 }
 0x32e   :  { %v307_v59 = vsel %vm305_vm1, %v300_v58, %v306_v27 }
 0x32f   :  { %557 = vtanh.f32 %v307_v59 }
 0x33c   :  { %v558_v60 = vpop.eup %557 }
 0x33d   :  { %v309_v61 = vmul.f32 0.5, %v558_v60 }
 0x33f   :  { %v310_v62 = vadd.f32 0.5, %v309_v61 }
 0x341   :  { %v742_v63 = vsel %vm305_vm1, %v558_v60, %v310_v62 }
 0x342   :  { %319 = vrot.lane.b32.xlu1 %v742_v63, %s657_s2  ;;  %v317_v2 = vmul.f32 %v487_v1, %v742_v63 }
 0x3b4   :  { %v320_v48 = vpop.permute.xlu1 %319 }
 0x3b5   :  { %v322_v0 = vmul.f32 %v320_v48, %v742_v63 }
 0x3b7   :  { %324 = vrot.lane.b32.xlu0 %v322_v0, %s657_s2 }
 0x429   :  { %v325_v3 = vpop.permute.xlu0 %324 }
 0x42a   :  { %v327_v4 = vadd.f32 %v325_v3, %v317_v2 }
 0x42c   :  { %v328_v5 = vsel %vm282_vm12, %v327_v4, 0.0 }
 0x42d   :  { %v329_v6 = vrot.slane %v328_v5, 4 }
 0x42f   :  { %v330_v7 = vadd.f32 %v329_v6, %v328_v5 }
 0x431   :  { %v331_v8 = vrot.slane %v330_v7, 2 }
 0x433   :  { %v332_v9 = vadd.f32 %v331_v8, %v330_v7 }
 0x435   :  { %v333_v10 = vrot.slane %v332_v9, 1 }
 0x437   :  { %v334_v11 = vadd.f32 %v333_v10, %v332_v9 }
 0x439   :  { %v335_v12 = vmul.f32 0.125, %v334_v11 }
 0x43b   :  { %v336_v13 = vsub.f32 %v327_v4, %v335_v12 }
 0x43d   :  { %v337_v14 = vmul.f32 %v336_v13, %v336_v13 }
 0x43f   :  { %v338_v15 = vsel %vm282_vm12, %v337_v14, 0.0 }
 0x440   :  { %v339_v16 = vrot.slane %v338_v15, 4 }
 0x442   :  { %v340_v17 = vadd.f32 %v339_v16, %v338_v15 }
 0x444   :  { %v341_v18 = vrot.slane %v340_v17, 2 }
 0x446   :  { %v342_v20 = vadd.f32 %v341_v18, %v340_v17 }
 0x448   :  { %v343_v21 = vrot.slane %v342_v20, 1 }
 0x44a   :  { %v344_v22 = vadd.f32 %v343_v21, %v342_v20 }
 0x44c   :  { %v345_v24 = vmul.f32 0.14285715, %v344_v22 }
 0x44e   :  { %559 = vrsqrt.f32 %v345_v24  ;;  %vm348_vm2 = vcmp.eq.f32.partialorder %v345_v24, inf  ;;  %v351_v28 = vand.u32 2147483648, %v345_v24  ;;  %vm350_vm3 = vcmp.eq.f32.partialorder %v345_v24, 0.0 }
 0x45b   :  { %v560_v25 = vpop.eup %559 }
 0x45c   :  { %v347_v26 = vmul.f32 %v560_v25, %v345_v24 }
 0x45e   :  { %v349_v29 = vsel %vm348_vm2, %v345_v24, %v347_v26 }
 0x45f   :  { %v352_v30 = vsel %vm350_vm3, %v351_v28, %v349_v29 }
 0x460   :  { %v353_v32 = vadd.f32 1e-05, %v352_v30 }
 0x462   :  { %561 = vrcp.f32 %v353_v32 }
 0x46f   :  { %v562_v34 = vpop.eup %561 }
 0x470   :  { %v356_v35 = vmul.f32 %v562_v34, %v355_v33 }
 0x472   :  { %v360_v36 = vrot.slane %v356_v35, %v732_v44 }
 0x474   :  { %v361_v38 = vmul.f32 %v360_v36, %v336_v13 }
 0x476   :  { %v367_v39 = vadd.f32 %v488_v37, %v361_v38 }
 0x478   :  { %563 = vtanh.f32 %v367_v39 }
 0x485   :  { %v564_v45 = vpop.eup %563 }
 0x486   :  { %370 = vrot.lane.b32.xlu1 %v564_v45, %s657_s2 }
 0x4f8   :  { %v371_v44 = vpop.permute.xlu1 %370 }
 0x4f9   :  { %v373_v47 = vmul.f32 %v371_v44, %v742_v63 }
 0x4fb   :  { %v390_v49 = vrot.slane %v373_v47, 7  ;;  %375 = vrot.lane.b32.xlu0 %v373_v47, %s656_s0 }
 0x4fd   :  { %391 = vrot.lane.b32.xlu1 %v390_v49, %s656_s0 }
 0x501   :  { %379 = vrot.lane.b32.xlu1 %v327_v4, %s656_s0 }
 0x56d   :  { %v376_v51 = vpop.permute.xlu0 %375 }
 0x56f   :  { %v392_v50 = vpop.permute.xlu1 %391 }
 0x570   :  { %524 = vmatmul.mubr.msk.f32.vlgmr.msra.gmra.mxu1 %vm282_vm12, %v392_v50 }
 0x573   :  { %v380_v52 = vpop.permute.xlu1 %379 }
 0x574   :  { %v382_v19 = vsel %vm282_vm12, %v376_v51, %v380_v52 }
 0x575   :  { %v383_v53 = vsel %vm284_vm13, %v382_v19, 0.0 }
 0x576   :  { %384 = vst [vmem:[#allocation8] sm:$0xff] %v383_v53 }
 0x630   :  { %v461_v55 = vpop.f32.mrf.mxu1 }
 0x631   :  { %v462_v23 = vadd.f32 %v461_v55, %v389_v54 }
 0x632   :  { %v525_v56 = vpop.f32.mrf.mxu1 }
 0x633   :  { %465 = vst [vmem:[#allocation8 + $0x8] sm:$0x1] %v462_v23 }
 0x634   :  { %636 = shalt.err (!%p633_p5)
}
 0x635   :  { %477 = dma.vmem_to_hbm [thread:$0]  %s472_s30, 256, %s769_s3, [#allocation4], %s653_s17, %s653_s17, %s654_s18  }
 0x636   :  { %649 = dma.done.wait [#allocation4], 256  }
 0x637   :  { %650 = vsyncadd [#allocation4], 4294967040 }
 0x638   :  { %481 = vsyncpa [#allocation3], 1 }
 0x639   :  { %482 = vsyncpa [#allocation6], 1 }
 0x63a   :  { %483 = vsyncpa [#allocation4], 1 }

</bundles_post_ra>
